<compile_context>
chip_gen: v7x
topology: tpu7x:2x2x1
jax: 0.10.0
libtpu: 0.0.40
codegen_flags: <defaults>
</compile_context>

<pallas_src>
import functools

import jax
import jax.numpy as jnp
import numpy as np
from jax import lax
from jax.experimental import pallas as pl
from jax.experimental.pallas import tpu as pltpu


def shallow_convnet_kernel(x_ref, w_ref, shift_ref, pool_ref, o_ref, *, B_blk, K, T_pad):
    w = w_ref[...]            # (F, K*C_pad)   conv1+conv2+BN-scale fused
    shift = shift_ref[...]    # (F, 1)         conv bias + BN shift fused
    pmat = pool_ref[...]      # (T_pad, n_pool) per-sample pooling matrix

    for b in range(B_blk):    # static unroll; B_blk is small (<= 32)
        xb = x_ref[b]         # (C_pad, S_in): one whole-vreg-aligned row load

        # Per-sample im2col: rows ordered (k, c) -> K shifted copies of the loaded row.
        # Columns t >= T1 contain zero-padded garbage; pmat is zero there.
        win = jnp.concatenate([xb[:, k:k + T_pad] for k in range(K)], axis=0)

        # Fused conv1 (1x25) + conv2 (chans x 1) + BatchNorm on the MXU.
        bn = jnp.dot(w, win, preferred_element_type=jnp.float32) + shift     # (F, T_pad)
        sq = bn * bn

        # AvgPool2d((1,75), stride (1,15)) as a matmul (keeps reduction on the MXU).
        pooled = jnp.dot(sq, pmat, preferred_element_type=jnp.float32)       # (F, n_pool)

        # clip(log(x), 1e-7, 1e7) exactly as in the reference module (clip AFTER log).
        # TODO(synk): nn.Dropout / train-mode BatchNorm not implemented (eval semantics).
        o_ref[0, b] = jnp.clip(jnp.log(pooled), 1e-7, 1e7).astype(o_ref.dtype)


def shallow_convnet_forward(x, w1, b1, w2, gamma, beta, rmean, rvar, *, block_b=32):
    """x: (B, 1, chans, samples) float32.  Returns (B, F * n_pool) features."""
    B, _, C, S = x.shape
    F, _, _, K = w1.shape                     # (40, 1, 1, 25)
    T1 = S - K + 1
    pool_k, pool_s = 75, 15
    n_pool = (T1 - pool_k) // pool_s + 1
    assert n_pool >= 1, "samples too small for the (1,75) avgpool"

    # ---- alignment padding ----
    C_pad = -(-C // 8) * 8                    # channels -> multiple of 8 (sublane tile)
    T_pad = -(-T1 // 128) * 128               # conv-output time -> multiple of 128
    S_in = -(-(T_pad + K - 1) // 128) * 128   # per-sample lane width, 128-aligned

    # ---- parameter fusion (tiny, one-time setup) ----
    w1m = w1.reshape(F, K)
    w2c = jnp.transpose(w2[..., 0], (2, 0, 1))                    # (C, F_out, F_in)
    wfused = jnp.einsum("cof,fk->okc", w2c, w1m)                  # (F, K, C)
    wfused = jnp.pad(wfused, ((0, 0), (0, 0), (0, C_pad - C)))    # zero taps on pad chans
    bfused = jnp.einsum("cof,f->o", w2c, b1)                      # conv1 bias through conv2
    eps = 1e-5
    scale = gamma / jnp.sqrt(rvar + eps)
    wscaled = (wfused * scale[:, None, None]).reshape(F, K * C_pad)   # BN scale folded in
    shift = (scale * (bfused - rmean) + beta).reshape(F, 1)           # biases + BN shift

    # ---- batch blocking: >= 2 parallel grid steps when B >= 2 (v7x has 2 TCs) ----
    if B > 1:
        B_blk = max(1, min(block_b, -(-B // 2)))
    else:
        B_blk = 1
    num_blocks = -(-B // B_blk)
    B_pad = num_blocks * B_blk
    x3 = x.reshape(B, C, S)
    x3 = jnp.pad(x3, ((0, B_pad - B), (0, C_pad - C), (0, S_in - S)))

    # ---- per-sample pooling matrix (T_pad, n_pool); zero rows for padded/garbage t ----
    t_idx = jnp.arange(T_pad)[:, None]
    p_idx = jnp.arange(n_pool)[None, :]
    pmat = ((t_idx >= p_idx * pool_s)
            & (t_idx < p_idx * pool_s + pool_k)
            & (t_idx < T1)).astype(jnp.float32) / float(pool_k)

    kernel = functools.partial(shallow_convnet_kernel, B_blk=B_blk, K=K, T_pad=T_pad)

    out = pl.pallas_call(
        kernel,
        out_shape=jax.ShapeDtypeStruct((num_blocks, B_blk, F, n_pool), jnp.float32),
        grid=(num_blocks,),
        in_specs=[
            pl.BlockSpec((B_blk, C_pad, S_in), lambda i: (i, 0, 0)),
            pl.BlockSpec((F, K * C_pad), lambda i: (0, 0)),
            pl.BlockSpec((F, 1), lambda i: (0, 0)),
            pl.BlockSpec((T_pad, n_pool), lambda i: (0, 0)),
        ],
        out_specs=pl.BlockSpec((1, B_blk, F, n_pool), lambda i: (i, 0, 0, 0)),
        compiler_params=pltpu.CompilerParams(
            dimension_semantics=("parallel",),
            vmem_limit_bytes=48 * 1024 * 1024),
    )(x3, wscaled, shift, pmat)

    # (blocks, B_blk, F, n_pool) -> (B, F*n_pool): only adjacent dims are merged, so
    # this reshape is free in HBM (no transpose pass), matching torch.flatten order.
    out = out.reshape(B_pad, F * n_pool)
    return out[:B]


def reference_forward(x, w1, b1, w2, gamma, beta, rmean, rvar):
    """Pure-JAX reference mirroring the PyTorch forward (eval mode)."""
    eps = 1e-5
    y = lax.conv_general_dilated(x, w1, (1, 1), "VALID",
                                 dimension_numbers=("NCHW", "OIHW", "NCHW"))
    y = y + b1[None, :, None, None]
    y = lax.conv_general_dilated(y, w2, (1, 1), "VALID",
                                 dimension_numbers=("NCHW", "OIHW", "NCHW"))
    y = (gamma[None, :, None, None] * (y - rmean[None, :, None, None])
         / jnp.sqrt(rvar[None, :, None, None] + eps) + beta[None, :, None, None])
    y = y * y
    y = lax.reduce_window(y, 0.0, lax.add, (1, 1, 1, 75), (1, 1, 1, 15), "VALID") / 75.0
    y = jnp.clip(jnp.log(y), 1e-7, 1e7)
    return y.reshape(y.shape[0], -1)


if __name__ == "__main__":
    # Small shapes consistent with the module: chans=4, samples=144 (>= 99 so the
    # (1,75)/15 avgpool yields at least one window), batch=2, 40 conv filters.
    B, chans, samples = 2, 4, 144
    conv_nums = 40
    K = 25

    key = jax.random.PRNGKey(0)
    ks = jax.random.split(key, 8)

    x = jax.random.normal(ks[0], (B, 1, chans, samples), dtype=jnp.float32)

    w1 = 0.2 * jax.random.normal(ks[1], (conv_nums, 1, 1, K), dtype=jnp.float32)
    b1 = 0.1 * jax.random.normal(ks[2], (conv_nums,), dtype=jnp.float32)
    w2 = 0.1 * jax.random.normal(ks[3], (conv_nums, conv_nums, chans, 1), dtype=jnp.float32)
    gamma = 0.5 + jax.random.uniform(ks[4], (conv_nums,), dtype=jnp.float32)
    beta = 0.1 * jax.random.normal(ks[5], (conv_nums,), dtype=jnp.float32)
    rmean = 0.1 * jax.random.normal(ks[6], (conv_nums,), dtype=jnp.float32)
    rvar = 0.5 + jax.random.uniform(ks[7], (conv_nums,), dtype=jnp.float32)

    out = shallow_convnet_forward(x, w1, b1, w2, gamma, beta, rmean, rvar)
    out = jax.block_until_ready(out)

    ref = reference_forward(x, w1, b1, w2, gamma, beta, rmean, rvar)
    np.testing.assert_allclose(np.asarray(out), np.asarray(ref), rtol=1e-4, atol=1e-4)

    print("KERNEL_OK")
</pallas_src>

<mosaic_0001>
module attributes {stable_mosaic.version = 11 : i64} {
  func.func @shallow_convnet_kernel(%arg0: i32, %arg1: memref<1x8x256xf32, #tpu.memory_space<vmem>>, %arg2: memref<40x200xf32, #tpu.memory_space<vmem>>, %arg3: memref<40x1xf32, #tpu.memory_space<vmem>>, %arg4: memref<128x4xf32, #tpu.memory_space<vmem>>, %arg5: memref<1x1x40x4xf32, #tpu.memory_space<vmem>>) attributes {dimension_semantics = [#tpu.dimension_semantics<parallel>], iteration_bounds = array<i64: 2>, scalar_prefetch = 0 : i64, scratch_operands = 0 : i64, tpu.core_type = #tpu.core_type<tc>, window_params = [{transform_indices = @transform_0, window_bounds = array<i64: 1, 8, 256>}, {pipeline_mode = #tpu.pipeline_mode<synchronous>, transform_indices = @transform_1, window_bounds = array<i64: 40, 200>}, {pipeline_mode = #tpu.pipeline_mode<synchronous>, transform_indices = @transform_2, window_bounds = array<i64: 40, 1>}, {pipeline_mode = #tpu.pipeline_mode<synchronous>, transform_indices = @transform_3, window_bounds = array<i64: 128, 4>}, {transform_indices = @transform_4, window_bounds = array<i64: 1, 1, 40, 4>}]} {
    %c0 = arith.constant 0 : index
    %c0_0 = arith.constant 0 : index
    %0 = vector.load %arg2[%c0, %c0_0] : memref<40x200xf32, #tpu.memory_space<vmem>>, vector<40x200xf32>
    %c0_1 = arith.constant 0 : index
    %c0_2 = arith.constant 0 : index
    %1 = vector.load %arg3[%c0_1, %c0_2] : memref<40x1xf32, #tpu.memory_space<vmem>>, vector<40x1xf32>
    %c0_3 = arith.constant 0 : index
    %c0_4 = arith.constant 0 : index
    %2 = vector.load %arg4[%c0_3, %c0_4] : memref<128x4xf32, #tpu.memory_space<vmem>>, vector<128x4xf32>
    %c0_5 = arith.constant 0 : index
    %c0_6 = arith.constant 0 : index
    %c0_7 = arith.constant 0 : index
    %3 = vector.load %arg1[%c0_5, %c0_6, %c0_7] : memref<1x8x256xf32, #tpu.memory_space<vmem>>, vector<1x8x256xf32>
    %4 = vector.shape_cast %3 : vector<1x8x256xf32> to vector<8x256xf32>
    %5 = vector.extract_strided_slice %4 {offsets = [0, 0], sizes = [8, 128], strides = [1, 1]} : vector<8x256xf32> to vector<8x128xf32>
    %6 = vector.extract_strided_slice %4 {offsets = [0, 1], sizes = [8, 128], strides = [1, 1]} : vector<8x256xf32> to vector<8x128xf32>
    %7 = vector.extract_strided_slice %4 {offsets = [0, 2], sizes = [8, 128], strides = [1, 1]} : vector<8x256xf32> to vector<8x128xf32>
    %8 = vector.extract_strided_slice %4 {offsets = [0, 3], sizes = [8, 128], strides = [1, 1]} : vector<8x256xf32> to vector<8x128xf32>
    %9 = vector.extract_strided_slice %4 {offsets = [0, 4], sizes = [8, 128], strides = [1, 1]} : vector<8x256xf32> to vector<8x128xf32>
    %10 = vector.extract_strided_slice %4 {offsets = [0, 5], sizes = [8, 128], strides = [1, 1]} : vector<8x256xf32> to vector<8x128xf32>
    %11 = vector.extract_strided_slice %4 {offsets = [0, 6], sizes = [8, 128], strides = [1, 1]} : vector<8x256xf32> to vector<8x128xf32>
    %12 = vector.extract_strided_slice %4 {offsets = [0, 7], sizes = [8, 128], strides = [1, 1]} : vector<8x256xf32> to vector<8x128xf32>
    %13 = vector.extract_strided_slice %4 {offsets = [0, 8], sizes = [8, 128], strides = [1, 1]} : vector<8x256xf32> to vector<8x128xf32>
    %14 = vector.extract_strided_slice %4 {offsets = [0, 9], sizes = [8, 128], strides = [1, 1]} : vector<8x256xf32> to vector<8x128xf32>
    %15 = vector.extract_strided_slice %4 {offsets = [0, 10], sizes = [8, 128], strides = [1, 1]} : vector<8x256xf32> to vector<8x128xf32>
    %16 = vector.extract_strided_slice %4 {offsets = [0, 11], sizes = [8, 128], strides = [1, 1]} : vector<8x256xf32> to vector<8x128xf32>
    %17 = vector.extract_strided_slice %4 {offsets = [0, 12], sizes = [8, 128], strides = [1, 1]} : vector<8x256xf32> to vector<8x128xf32>
    %18 = vector.extract_strided_slice %4 {offsets = [0, 13], sizes = [8, 128], strides = [1, 1]} : vector<8x256xf32> to vector<8x128xf32>
    %19 = vector.extract_strided_slice %4 {offsets = [0, 14], sizes = [8, 128], strides = [1, 1]} : vector<8x256xf32> to vector<8x128xf32>
    %20 = vector.extract_strided_slice %4 {offsets = [0, 15], sizes = [8, 128], strides = [1, 1]} : vector<8x256xf32> to vector<8x128xf32>
    %21 = vector.extract_strided_slice %4 {offsets = [0, 16], sizes = [8, 128], strides = [1, 1]} : vector<8x256xf32> to vector<8x128xf32>
    %22 = vector.extract_strided_slice %4 {offsets = [0, 17], sizes = [8, 128], strides = [1, 1]} : vector<8x256xf32> to vector<8x128xf32>
    %23 = vector.extract_strided_slice %4 {offsets = [0, 18], sizes = [8, 128], strides = [1, 1]} : vector<8x256xf32> to vector<8x128xf32>
    %24 = vector.extract_strided_slice %4 {offsets = [0, 19], sizes = [8, 128], strides = [1, 1]} : vector<8x256xf32> to vector<8x128xf32>
    %25 = vector.extract_strided_slice %4 {offsets = [0, 20], sizes = [8, 128], strides = [1, 1]} : vector<8x256xf32> to vector<8x128xf32>
    %26 = vector.extract_strided_slice %4 {offsets = [0, 21], sizes = [8, 128], strides = [1, 1]} : vector<8x256xf32> to vector<8x128xf32>
    %27 = vector.extract_strided_slice %4 {offsets = [0, 22], sizes = [8, 128], strides = [1, 1]} : vector<8x256xf32> to vector<8x128xf32>
    %28 = vector.extract_strided_slice %4 {offsets = [0, 23], sizes = [8, 128], strides = [1, 1]} : vector<8x256xf32> to vector<8x128xf32>
    %29 = vector.extract_strided_slice %4 {offsets = [0, 24], sizes = [8, 128], strides = [1, 1]} : vector<8x256xf32> to vector<8x128xf32>
    %30 = tpu.concatenate %5, %6, %7, %8, %9, %10, %11, %12, %13, %14, %15, %16, %17, %18, %19, %20 in 0 : vector<8x128xf32>, vector<8x128xf32>, vector<8x128xf32>, vector<8x128xf32>, vector<8x128xf32>, vector<8x128xf32>, vector<8x128xf32>, vector<8x128xf32>, vector<8x128xf32>, vector<8x128xf32>, vector<8x128xf32>, vector<8x128xf32>, vector<8x128xf32>, vector<8x128xf32>, vector<8x128xf32>, vector<8x128xf32> -> vector<128x128xf32>
    %31 = tpu.concatenate %21, %22, %23, %24, %25, %26, %27, %28, %29 in 0 : vector<8x128xf32>, vector<8x128xf32>, vector<8x128xf32>, vector<8x128xf32>, vector<8x128xf32>, vector<8x128xf32>, vector<8x128xf32>, vector<8x128xf32>, vector<8x128xf32> -> vector<72x128xf32>
    %32 = tpu.concatenate %30, %31 in 0 : vector<128x128xf32>, vector<72x128xf32> -> vector<200x128xf32>
    %cst = arith.constant dense<0.000000e+00> : vector<40x128xf32>
    %33 = tpu.matmul %0, %32, %cst {dimension_numbers = #tpu.dot_dimension_numbers<[1], [0], [0], [1], [0, 0, 1, 1], [], []>} : vector<40x200xf32>, vector<200x128xf32>, vector<40x128xf32> -> vector<40x128xf32>
    %34 = vector.broadcast %1 : vector<40x1xf32> to vector<40x128xf32>
    %35 = arith.addf %33, %34 : vector<40x128xf32>
    %36 = arith.mulf %35, %35 : vector<40x128xf32>
    %cst_8 = arith.constant dense<0.000000e+00> : vector<40x4xf32>
    %37 = tpu.matmul %36, %2, %cst_8 {dimension_numbers = #tpu.dot_dimension_numbers<[1], [0], [0], [1], [0, 0, 1, 1], [], []>} : vector<40x128xf32>, vector<128x4xf32>, vector<40x4xf32> -> vector<40x4xf32>
    %38 = math.log %37 : vector<40x4xf32>
    %cst_9 = arith.constant 1.000000e-07 : f32
    %cst_10 = arith.constant 1.000000e+07 : f32
    %39 = vector.broadcast %cst_9 : f32 to vector<40x4xf32>
    %40 = arith.maximumf %39, %38 : vector<40x4xf32>
    %41 = vector.broadcast %cst_10 : f32 to vector<40x4xf32>
    %42 = arith.minimumf %41, %40 : vector<40x4xf32>
    %c0_11 = arith.constant 0 : index
    %c0_12 = arith.constant 0 : index
    %c0_13 = arith.constant 0 : index
    %c0_14 = arith.constant 0 : index
    %43 = vector.load %arg5[%c0_11, %c0_12, %c0_13, %c0_14] : memref<1x1x40x4xf32, #tpu.memory_space<vmem>>, vector<1x1x40x4xf32>
    %44 = vector.shape_cast %43 : vector<1x1x40x4xf32> to vector<40x4xf32>
    %45 = vector.shape_cast %42 : vector<40x4xf32> to vector<1x1x40x4xf32>
    tpu.vector_store %arg5[%c0_11, %c0_12, %c0_13, %c0_14], %45 {strides = array<i32>} : memref<1x1x40x4xf32, #tpu.memory_space<vmem>>, vector<1x1x40x4xf32>,
    return
  }
  func.func @transform_0(%arg0: i32) -> (i32, i32, i32) {
    %c0_i32 = arith.constant 0 : i32
    %c0_i32_0 = arith.constant 0 : i32
    %c0_i32_1 = arith.constant 0 : i32
    return %arg0, %c0_i32, %c0_i32_0 : i32, i32, i32
  }
  func.func @transform_1(%arg0: i32) -> (i32, i32) {
    %c0_i32 = arith.constant 0 : i32
    %c0_i32_0 = arith.constant 0 : i32
    %c0_i32_1 = arith.constant 0 : i32
    return %c0_i32, %c0_i32_0 : i32, i32
  }
  func.func @transform_2(%arg0: i32) -> (i32, i32) {
    %c0_i32 = arith.constant 0 : i32
    %c0_i32_0 = arith.constant 0 : i32
    %c0_i32_1 = arith.constant 0 : i32
    return %c0_i32, %c0_i32_0 : i32, i32
  }
  func.func @transform_3(%arg0: i32) -> (i32, i32) {
    %c0_i32 = arith.constant 0 : i32
    %c0_i32_0 = arith.constant 0 : i32
    %c0_i32_1 = arith.constant 0 : i32
    return %c0_i32, %c0_i32_0 : i32, i32
  }
  func.func @transform_4(%arg0: i32) -> (i32, i32, i32, i32) {
    %c0_i32 = arith.constant 0 : i32
    %c0_i32_0 = arith.constant 0 : i32
    %c0_i32_1 = arith.constant 0 : i32
    %c0_i32_2 = arith.constant 0 : i32
    return %arg0, %c0_i32, %c0_i32_0, %c0_i32_1 : i32, i32, i32, i32
  }
}

</mosaic_0001>

<bundles_post_ra>
// kernel: tpu_custom_call.1
= control target key start
LH: loop header
LB: loop body
LE: loop exit
PB: predicated region body
PF: predicated region fallthrough
CT: control target
= control target key end

     0   :  { %s1048_s15 = smov 0   ;;  %s1216_s0 = inlined_call_operand.vmem [shape: f32[2,8,256], index: 0, kind: input, shape index: {}]   ;;  %s1217_s1 = inlined_call_operand.vmem [shape: f32[40,200], index: 1, kind: input, shape index: {}]   ;;  %s1218_s2 = inlined_call_operand.vmem [shape: f32[40,1], index: 2, kind: input, shape index: {}]   ;;  %s1219_s3 = inlined_call_operand.vmem [shape: f32[128,4], index: 3, kind: input, shape index: {}]   ;;  %s1220_s4 = inlined_call_operand.vmem [shape: f32[2,1,40,4], index: 4, kind: output, shape index: {}]  }
   0x1 LB: > { %s700_s16 = sadd.s32 4294967295, %s1001_s15   ;;  %p704_p0 = scmp.ge.s32.totalorder %s1001_s15, 1  ;;  %s1001_s15 = sphi %s1048_s15, %s14_s15  }
   0x2   : > { %p162_p1 = scmp.lt.s32.totalorder %s1001_s15, 3 }
   0x4   : > { %p163_p2 = pnand %p704_p0, %p162_p1 }
   0x5   : > { %p188_p3 = scmp.lt.s32.totalorder (!%p163_p2), %s700_s16, 1  ;;  %v1003_v0 = vmov (!%p163_p2), 0.0|0.0   ;;  %s1004_s21 = smov (!%p163_p2), 127   ;;  %vm237_vm0 = vcmask (!%p163_p2), 1039360   ;;  %vm251_vm1 = vcmask (!%p163_p2), 1022976   ;;  %vm244_vm2 = vcmask (!%p163_p2), 1031168  }
   0x6   : > { %166 = sbr.rel (%p163_p2) target bundleno = 738 (0x2e2), region = 36  ;;  %784 = vmatprep.subr.bf16.mxu0 (!%p163_p2), %v1003_v0  ;;  %820 = vmatprep.subr.bf16.mxu1 (!%p163_p2), %v1003_v0  ;;  %s1005_s22 = smov (!%p163_p2), 125   ;;  %vm258_vm3 = vcmask (!%p163_p2), 1014784   ;;  %vm265_vm4 = vcmask (!%p163_p2), 1006592   ;;  %vm272_vm5 = vcmask (!%p163_p2), 998400   ;;  %vm279_vm6 = vcmask (!%p163_p2), 990208  }
   0x7   : > { %s1006_s23 = smov (!%p163_p2), 126   ;;  %s1007_s24 = smov (!%p163_p2), 124   ;;  %vm286_vm7 = vcmask (!%p163_p2), 982016   ;;  %v199_v41 = vld [vmem:[%s1217_s1 + $0x8] sm:$0xff] (!%p163_p2)  ;;  %vm418_vm8 = vcmask (!%p163_p2), 588800   ;;  %vm293_vm9 = vcmask (!%p163_p2), 973824  }
   0x8   : > { %s1008_s25 = smov (!%p163_p2), 123   ;;  %s1009_s26 = smov (!%p163_p2), 122   ;;  %708 = vmatprep.mubr.msk.f32.mxu0 (!%p163_p2), %vm418_vm8, %v199_v41  ;;  %vm300_vm10 = vcmask (!%p163_p2), 965632   ;;  %vm307_vm11 = vcmask (!%p163_p2), 957440   ;;  %vm314_vm12 = vcmask (!%p163_p2), 949248   ;;  %vm321_vm13 = vcmask (!%p163_p2), 941056  }
   0x9   : > { %s1010_s27 = smov (!%p163_p2), 121   ;;  %s1011_s28 = smov (!%p163_p2), 120   ;;  %vm328_vm14 = vcmask (!%p163_p2), 932864   ;;  %vm335_vm15 = vcmask (!%p163_p2), 924672   ;;  %v226_v41 = vld [vmem:[%s1219_s3 + $0x68] sm:$0xff] (!%p163_p2) }
   0xa   : > { %s1012_s29 = smov (!%p163_p2), 119   ;;  %s1013_s30 = smov (!%p163_p2), 117  }
   0xb   : > { %s1014_s5 = smov (!%p163_p2), 118   ;;  %s1015_s6 = smov (!%p163_p2), 115  }
   0xc   : > { %s1016_s7 = smov (!%p163_p2), 116   ;;  %s1017_s8 = smov (!%p163_p2), 113  }
   0xd   : > { %s1222_s16 = smov (!%p188_p3, %s700_s16), 1  ;;  %s1018_s9 = smov 114  }
   0xe   : > { %s715_s17 = sshll.u32 %s1222_s16, 4  ;;  %s1019_s10 = smov 112  }
   0xf   : > { %s192_s20 = scalar_lea.vmem %s1216_s0, %s715_s17 }
  0x10   : > { %v229_v1 = vld [vmem:[%s192_s20] sm:$0xff]  ;;  %v230_v2 = vld [vmem:[%s192_s20 + $0x8] sm:$0xff] }
  0x11   : > { %v873_v3 = vpack.i.bf16 %v230_v2, %v229_v1 }
  0x13   : > { %874 = vrot.lane.b32.xlu0 %v873_v3, %s1004_s21  ;;  %884 = vrot.lane.b32.xlu1 %v873_v3, %s1005_s22 }
  0x17   : > { %879 = vrot.lane.b32.xlu0 %v873_v3, %s1006_s23  ;;  %889 = vrot.lane.b32.xlu1 %v873_v3, %s1007_s24 }
  0x1b   : > { %894 = vrot.lane.b32.xlu0 %v873_v3, %s1008_s25  ;;  %899 = vrot.lane.b32.xlu1 %v873_v3, %s1009_s26 }
  0x1f   : > { %904 = vrot.lane.b32.xlu0 %v873_v3, %s1010_s27  ;;  %282 = vrot.lane.b32.xlu1 %v229_v1, %s1011_s28  ;;  %s844_s27 = smul.u32 40, %s1222_s16 }
  0x23   : > { %909 = vrot.lane.b32.xlu1 %v873_v3, %s1012_s29  ;;  %284 = vrot.lane.b32.xlu0 %v230_v2, %s1011_s28 }
  0x27   : > { %919 = vrot.lane.b32.xlu1 %v873_v3, %s1013_s30  ;;  %914 = vrot.lane.b32.xlu0 %v873_v3, %s1014_s5  ;;  %s197_s30 = scalar_lea.vmem %s1220_s4, %s844_s27 }
  0x2b   : > { %929 = vrot.lane.b32.xlu1 %v873_v3, %s1015_s6  ;;  %924 = vrot.lane.b32.xlu0 %v873_v3, %s1016_s7 }
  0x2f   : > { %939 = vrot.lane.b32.xlu1 %v873_v3, %s1017_s8  ;;  %934 = vrot.lane.b32.xlu0 %v873_v3, %s1018_s9 }
  0x33   : > { %944 = vrot.lane.b32.xlu0 %v873_v3, %s1019_s10 }
  0x85   : > { %v875_v4 = vpop.permute.xlu0 %874  ;;  %v885_v5 = vpop.permute.xlu1 %884 }
  0x86   : > { %v877_v6 = vunpack.i.h.bf16 %v875_v4  ;;  %v876_v7 = vunpack.i.l.bf16 %v875_v4  ;;  %v887_v8 = vunpack.i.h.bf16 %v885_v5  ;;  %v886_v9 = vunpack.i.l.bf16 %v885_v5 }
  0x88   : > { %v238_v10 = vsel %vm237_vm0, %v876_v7, %v877_v6  ;;  %v252_v11 = vsel %vm251_vm1, %v886_v9, %v887_v8  ;;  %vm374_vm0 = vcmask 916480   ;;  %vm1022_vm1 = vmmov 0  }
  0x89   : > { %v948_v12 = vpack.i.bf16 %v877_v6, %v238_v10  ;;  %v880_v13 = vpop.permute.xlu0 %879  ;;  %v785_v14 = vpack.c.bf16 %v238_v10, %v229_v1  ;;  %v890_v15 = vpop.permute.xlu1 %889  ;;  %v958_v20 = vpack.i.bf16 %v887_v8, %v252_v11 }
  0x8a   : > { %v882_v16 = vunpack.i.h.bf16 %v880_v13  ;;  %v881_v17 = vunpack.i.l.bf16 %v880_v13  ;;  %v892_v18 = vunpack.i.h.bf16 %v890_v15  ;;  %v891_v19 = vunpack.i.l.bf16 %v890_v15  ;;  %v208_v15 = vld [vmem:[%s1218_s2] sm:$0xff] }
  0x8b   : > { %949 = vrot.lane.b32.xlu1 %v948_v12, %s1019_s10  ;;  %786 = vmatpush1.bf16.msra.mxu0 %v785_v14 }
  0x8c   : > { %v245_v21 = vsel %vm244_vm2, %v881_v17, %v882_v16  ;;  %v259_v22 = vsel %vm258_vm3, %v891_v19, %v892_v18  ;;  %787 = vmatprep.subr.bf16.mxu0 %v1003_v0  ;;  %v213_v19 = vld [vmem:[%s1219_s3] sm:$0xff]  ;;  %vm639_vm2 = vcmask 31744  }
  0x8d   : > { %v953_v23 = vpack.i.bf16 %v882_v16, %v245_v21  ;;  %v895_v24 = vpop.permute.xlu0 %894  ;;  %v788_v25 = vpack.c.bf16 %v252_v11, %v245_v21  ;;  %v900_v26 = vpop.permute.xlu1 %899  ;;  %v963_v31 = vpack.i.bf16 %v892_v18, %v259_v22  ;;  %v209_v16 = vld [vmem:[%s1218_s2 + $0x8] sm:$0xff]  ;;  %v1020_v18 = vmov 0   ;;  %v215_v21 = vld [vmem:[%s1219_s3 + $0x10] sm:$0xff] }
  0x8e   : > { %v897_v27 = vunpack.i.h.bf16 %v895_v24  ;;  %v896_v28 = vunpack.i.l.bf16 %v895_v24  ;;  %v902_v29 = vunpack.i.h.bf16 %v900_v26  ;;  %v901_v30 = vunpack.i.l.bf16 %v900_v26  ;;  %984 = vset.pattern.permute.xlu1 %v1020_v18  ;;  %983 = vset.pattern.permute.xlu0 %v1020_v18 }
  0x8f   : > { %954 = vrot.lane.b32.xlu0 %v953_v23, %s1019_s10  ;;  %959 = vrot.lane.b32.xlu1 %v958_v20, %s1019_s10  ;;  %v214_v20 = vld [vmem:[%s1219_s3 + $0x8] sm:$0xff]  ;;  %v210_v23 = vld [vmem:[%s1218_s2 + $0x10] sm:$0xff]  ;;  %v1021_v18 = vmov 0.0  }
  0x90   : > { %v266_v32 = vsel %vm265_vm4, %v896_v28, %v897_v27  ;;  %789 = vmatpush1.bf16.msra.mxu0 %v788_v25  ;;  %v273_v33 = vsel %vm272_vm5, %v901_v30, %v902_v29  ;;  %v821_v24 = vpack.c.bf16 %v214_v20, %v213_v19  ;;  %v211_v25 = vld [vmem:[%s1218_s2 + $0x18] sm:$0xff]  ;;  %v218_v28 = vld [vmem:[%s1219_s3 + $0x28] sm:$0xff]  ;;  %v198_v20 = vld [vmem:[%s1217_s1] sm:$0xff]  ;;  %769 = vmatprep.mubr.msk.f32.mxu1 %vm1022_vm1, %v1021_v18 }
  0x91   : > { %v968_v34 = vpack.i.bf16 %v897_v27, %v266_v32  ;;  %v905_v35 = vpop.permute.xlu0 %904  ;;  %790 = vmatprep.subr.bf16.mxu0 %v1003_v0  ;;  %v791_v36 = vpack.c.bf16 %v266_v32, %v259_v22  ;;  %v283_v37 = vpop.permute.xlu1 %282  ;;  %v973_v40 = vpack.i.bf16 %v902_v29, %v273_v33  ;;  %v216_v22 = vld [vmem:[%s1219_s3 + $0x18] sm:$0xff]  ;;  %v217_v27 = vld [vmem:[%s1219_s3 + $0x20] sm:$0xff] }
  0x92   : > { %v907_v38 = vunpack.i.h.bf16 %v905_v35  ;;  %v906_v39 = vunpack.i.l.bf16 %v905_v35  ;;  %822 = vmatpush3.bf16.msra.mxu1 %v821_v24  ;;  %v824_v26 = vpack.c.bf16 %v216_v22, %v215_v21  ;;  %v212_v29 = vld [vmem:[%s1218_s2 + $0x20] sm:$0xff]  ;;  %v827_v30 = vpack.c.bf16 %v218_v28, %v217_v27  ;;  %v220_v32 = vld [vmem:[%s1219_s3 + $0x38] sm:$0xff]  ;;  %v222_v35 = vld [vmem:[%s1219_s3 + $0x48] sm:$0xff] }
  0x93   : > { %964 = vrot.lane.b32.xlu0 %v963_v31, %s1019_s10  ;;  %969 = vrot.lane.b32.xlu1 %v968_v34, %s1019_s10  ;;  %v219_v31 = vld [vmem:[%s1219_s3 + $0x30] sm:$0xff]  ;;  %v221_v34 = vld [vmem:[%s1219_s3 + $0x40] sm:$0xff] }
  0x94   : > { %v280_v42 = vsel %vm279_vm6, %v906_v39, %v907_v38  ;;  %792 = vmatpush1.bf16.msra.mxu0 %v791_v36  ;;  %823 = vmatprep.subr.bf16.mxu1 %v1003_v0  ;;  %v833_v36 = vpack.c.bf16 %v222_v35, %v221_v34  ;;  %v200_v21 = vld [vmem:[%s1217_s1 + $0x10] sm:$0xff]  ;;  %v203_v22 = vld [vmem:[%s1217_s1 + $0x28] sm:$0xff]  ;;  %v205_v24 = vld [vmem:[%s1217_s1 + $0x38] sm:$0xff] }
  0x95   : > { %v978_v43 = vpack.i.bf16 %v907_v38, %v280_v42  ;;  %793 = vmatprep.subr.bf16.mxu0 %v1003_v0  ;;  %v794_v44 = vpack.c.bf16 %v280_v42, %v273_v33  ;;  %v910_v45 = vpop.permute.xlu1 %909  ;;  %v285_v46 = vpop.permute.xlu0 %284  ;;  %v830_v33 = vpack.c.bf16 %v220_v32, %v219_v31  ;;  %v224_v38 = vld [vmem:[%s1219_s3 + $0x58] sm:$0xff]  ;;  %v206_v27 = vld [vmem:[%s1217_s1 + $0x40] sm:$0xff]  ;;  %v227_v28 = vld [vmem:[%s1219_s3 + $0x70] sm:$0xff] }
  0x96   : > { %v912_v47 = vunpack.i.h.bf16 %v910_v45  ;;  %v911_v48 = vunpack.i.l.bf16 %v910_v45  ;;  %v287_v49 = vsel %vm286_vm7, %v283_v37, %v285_v46  ;;  %825 = vmatpush3.bf16.msra.mxu1 %v824_v26  ;;  %v223_v37 = vld [vmem:[%s1219_s3 + $0x50] sm:$0xff]  ;;  %v207_v26 = vld [vmem:[%s1217_s1 + $0x48] sm:$0xff] }
  0x97   : > { %974 = vrot.lane.b32.xlu0 %v973_v40, %s1019_s10  ;;  %979 = vrot.lane.b32.xlu1 %v978_v43, %s1019_s10  ;;  %v836_v39 = vpack.c.bf16 %v224_v38, %v223_v37  ;;  %v225_v40 = vld [vmem:[%s1219_s3 + $0x60] sm:$0xff] }
  0x98   : > { %795 = vmatpush1.bf16.msra.mxu0 %v794_v44  ;;  %v294_v50 = vsel %vm293_vm9, %v911_v48, %v912_v47  ;;  %826 = vmatprep.subr.bf16.mxu1 %v1003_v0  ;;  %v839_v42 = vpack.c.bf16 %v226_v41, %v225_v40 }
  0x99   : > { %v797_v51 = vpack.c.bf16 %v294_v50, %v287_v49  ;;  %796 = vmatprep.subr.bf16.mxu0 %v1003_v0  ;;  %v920_v52 = vpop.permute.xlu1 %919  ;;  %v915_v53 = vpop.permute.xlu0 %914 }
  0x9a   : > { %v922_v54 = vunpack.i.h.bf16 %v920_v52  ;;  %v921_v55 = vunpack.i.l.bf16 %v920_v52  ;;  %v917_v56 = vunpack.i.h.bf16 %v915_v53  ;;  %v916_v57 = vunpack.i.l.bf16 %v915_v53  ;;  %828 = vmatpush3.bf16.msra.mxu1 %v827_v30 }
  0x9b   : > { %370 = vrot.lane.b32.xlu0 %v287_v49, %s1019_s10  ;;  %372 = vrot.lane.b32.xlu1 %v285_v46, %s1019_s10 }
  0x9c   : > { %798 = vmatpush1.bf16.msra.mxu0 %v797_v51  ;;  %v301_v58 = vsel %vm300_vm10, %v916_v57, %v917_v56  ;;  %v308_v59 = vsel %vm307_vm11, %v921_v55, %v922_v54  ;;  %829 = vmatprep.subr.bf16.mxu1 %v1003_v0 }
  0x9d   : > { %v930_v60 = vpop.permute.xlu1 %929  ;;  %v925_v61 = vpop.permute.xlu0 %924  ;;  %799 = vmatprep.subr.bf16.mxu0 %v1003_v0  ;;  %v800_v62 = vpack.c.bf16 %v308_v59, %v301_v58 }
  0x9e   : > { %v932_v63 = vunpack.i.h.bf16 %v930_v60  ;;  %v931_v1 = vunpack.i.l.bf16 %v930_v60  ;;  %v927_v2 = vunpack.i.h.bf16 %v925_v61  ;;  %v926_v3 = vunpack.i.l.bf16 %v925_v61  ;;  %831 = vmatpush3.bf16.msra.mxu1 %v830_v33 }
  0x9f   : > { %400 = vperm.xlu1 %984, %v209_v16   ;;  %395 = vperm.xlu0 %983, %v208_v15  }
  0xa0   : > { %801 = vmatpush1.bf16.msra.mxu0 %v800_v62  ;;  %v315_v4 = vsel %vm314_vm12, %v926_v3, %v927_v2  ;;  %v322_v5 = vsel %vm321_vm13, %v931_v1, %v932_v63  ;;  %832 = vmatprep.subr.bf16.mxu1 %v1003_v0 }
  0xa1   : > { %v940_v6 = vpop.permute.xlu1 %939  ;;  %v935_v7 = vpop.permute.xlu0 %934  ;;  %802 = vmatprep.subr.bf16.mxu0 %v1003_v0  ;;  %v803_v8 = vpack.c.bf16 %v322_v5, %v315_v4 }
  0xa2   : > { %v942_v9 = vunpack.i.h.bf16 %v940_v6  ;;  %v941_v10 = vunpack.i.l.bf16 %v940_v6  ;;  %v937_v11 = vunpack.i.h.bf16 %v935_v7  ;;  %v936_v12 = vunpack.i.l.bf16 %v935_v7  ;;  %834 = vmatpush3.bf16.msra.mxu1 %v833_v36 }
  0xa3   : > { %405 = vperm.xlu1 %984, %v210_v23   ;;  %410 = vperm.xlu0 %983, %v211_v25   ;;  %v202_v23 = vld [vmem:[%s1217_s1 + $0x20] sm:$0xff]  ;;  %v204_v25 = vld [vmem:[%s1217_s1 + $0x30] sm:$0xff] }
  0xa4   : > { %804 = vmatpush1.bf16.msra.mxu0 %v803_v8  ;;  %v329_v13 = vsel %vm328_vm14, %v936_v12, %v937_v11  ;;  %v336_v14 = vsel %vm335_vm15, %v941_v10, %v942_v9  ;;  %835 = vmatprep.subr.bf16.mxu1 %v1003_v0 }
  0xa5   : > { %805 = vmatprep.subr.bf16.mxu0 %v1003_v0  ;;  %v806_v17 = vpack.c.bf16 %v336_v14, %v329_v13  ;;  %v945_v43 = vpop.permute.xlu0 %944 }
  0xa6   : > { %837 = vmatpush3.bf16.msra.mxu1 %v836_v39  ;;  %v947_v44 = vunpack.i.h.bf16 %v945_v43  ;;  %v946_v45 = vunpack.i.l.bf16 %v945_v43 }
  0xa7   : > { %415 = vperm.xlu1 %984, %v212_v29   ;;  %838 = vmatprep.subr.bf16.mxu1 %v1003_v0  ;;  %v228_v29 = vld [vmem:[%s1219_s3 + $0x78] sm:$0xff] }
  0xa8   : > { %807 = vmatpush1.bf16.msra.mxu0 %v806_v17  ;;  %v375_v49 = vsel %vm374_vm0, %v946_v45, %v947_v44  ;;  %v842_v30 = vpack.c.bf16 %v228_v29, %v227_v28 }
  0xa9   : > { %808 = vmatprep.subr.bf16.mxu0 %v1003_v0 }
  0xaa   : > { %840 = vmatpush3.bf16.msra.mxu1 %v839_v42 }
  0xab   : > { %841 = vmatprep.subr.bf16.mxu1 %v1003_v0 }
  0xae   : > { %843 = vmatpush3.bf16.msra.mxu1 %v842_v30 }
  0xfd   : > { %v950_v46 = vpop.permute.xlu1 %949 }
  0xfe   : > { %v952_v47 = vunpack.i.h.bf16 %v950_v46  ;;  %v951_v48 = vunpack.i.l.bf16 %v950_v46 }
 0x100   : > { %v376_v50 = vsel %vm374_vm0, %v951_v48, %v952_v47 }
 0x101   : > { %v955_v51 = vpop.permute.xlu0 %954  ;;  %v960_v52 = vpop.permute.xlu1 %959  ;;  %v809_v53 = vpack.c.bf16 %v376_v50, %v375_v49 }
 0x102   : > { %v957_v54 = vunpack.i.h.bf16 %v955_v51  ;;  %v956_v55 = vunpack.i.l.bf16 %v955_v51  ;;  %v962_v56 = vunpack.i.h.bf16 %v960_v52  ;;  %v961_v57 = vunpack.i.l.bf16 %v960_v52 }
 0x103   : > { %810 = vmatpush1.bf16.msra.mxu0 %v809_v53 }
 0x104   : > { %811 = vmatprep.subr.bf16.mxu0 %v1003_v0  ;;  %v377_v58 = vsel %vm374_vm0, %v956_v55, %v957_v54  ;;  %v378_v59 = vsel %vm374_vm0, %v961_v57, %v962_v56 }
 0x105   : > { %v965_v60 = vpop.permute.xlu0 %964  ;;  %v970_v61 = vpop.permute.xlu1 %969  ;;  %v812_v62 = vpack.c.bf16 %v378_v59, %v377_v58 }
 0x106   : > { %v967_v63 = vunpack.i.h.bf16 %v965_v60  ;;  %v966_v1 = vunpack.i.l.bf16 %v965_v60  ;;  %v972_v2 = vunpack.i.h.bf16 %v970_v61  ;;  %v971_v3 = vunpack.i.l.bf16 %v970_v61 }
 0x107   : > { %813 = vmatpush1.bf16.msra.mxu0 %v812_v62 }
 0x108   : > { %814 = vmatprep.subr.bf16.mxu0 %v1003_v0  ;;  %v379_v4 = vsel %vm374_vm0, %v966_v1, %v967_v63  ;;  %v380_v5 = vsel %vm374_vm0, %v971_v3, %v972_v2 }
 0x109   : > { %v975_v6 = vpop.permute.xlu0 %974  ;;  %v980_v7 = vpop.permute.xlu1 %979  ;;  %v815_v8 = vpack.c.bf16 %v380_v5, %v379_v4 }
 0x10a   : > { %v977_v9 = vunpack.i.h.bf16 %v975_v6  ;;  %v976_v10 = vunpack.i.l.bf16 %v975_v6  ;;  %v982_v11 = vunpack.i.h.bf16 %v980_v7  ;;  %v981_v12 = vunpack.i.l.bf16 %v980_v7 }
 0x10b   : > { %816 = vmatpush1.bf16.msra.mxu0 %v815_v8 }
 0x10c   : > { %817 = vmatprep.subr.bf16.mxu0 %v1003_v0  ;;  %v381_v13 = vsel %vm374_vm0, %v976_v10, %v977_v9  ;;  %v382_v14 = vsel %vm374_vm0, %v981_v12, %v982_v11  ;;  %v201_v0 = vld [vmem:[%s1217_s1 + $0x18] sm:$0xff] }
 0x10d   : > { %v818_v15 = vpack.c.bf16 %v382_v14, %v381_v13  ;;  %v371_v16 = vpop.permute.xlu0 %370  ;;  %v373_v17 = vpop.permute.xlu1 %372 }
 0x10e   : > { %v383_v19 = vsel %vm374_vm0, %v371_v16, %v373_v17 }
 0x10f   : > { %819 = vmatpush1.bf16.msra.mxu0 %v818_v15 }
 0x110   : > { %482 = vmatprep.subr.mxu0 %v1021_v18 }
 0x113   : > { %483 = vmatpush1.msra.mxu0 %v383_v19 }
 0x114   : > { %499 = vmatmul.mubr.f32.vlgmr.msra.gmra.mrb[0].mxu0 %v198_v20 }
 0x115   : > { %709 = vmatprep.mubr.msk.f32.mxu0 %vm418_vm8, %v201_v0 }
 0x118   : > { %504 = vmatmul.mubr.f32.gmra.mrb[2].mxu0 %v200_v21 }
 0x119   : > { %710 = vmatprep.mubr.msk.f32.mxu0 %vm418_vm8, %v203_v22 }
 0x11c   : > { %509 = vmatmul.mubr.f32.gmra.mrb[4].mxu0 %v202_v23 }
 0x11d   : > { %711 = vmatprep.mubr.msk.f32.mxu0 %vm418_vm8, %v205_v24 }
 0x11e   : > { %v396_v31 = vpop.permute.xlu0 %395  ;;  %v401_v35 = vpop.permute.xlu1 %400 }
 0x120   : > { %514 = vmatmul.mubr.f32.gmra.mrb[6].mxu0 %v204_v25 }
 0x121   : > { %712 = vmatprep.mubr.msk.f32.mxu0 %vm418_vm8, %v207_v26 }
 0x122   : > { %v406_v41 = vpop.permute.xlu1 %405  ;;  %v411_v46 = vpop.permute.xlu0 %410 }
 0x124   : > { %519 = vmatmul.mubr.f32.gmra.mrb[8].mxu0 %v206_v27 }
 0x126   : > { %v416_v51 = vpop.permute.xlu1 %415 }
 0x1e7   : > { %v500_v32 = vpop.f32.mrb[0].mxu0 }
 0x1e8   : > { %v501_v33 = vadd.f32 %v500_v32, %v396_v31  ;;  %v502_v34 = vpop.f32.mrb[1].mxu0 }
 0x1ea   : > { %v524_v36 = vmul.f32 %v501_v33, %v501_v33 }
 0x1eb   : > { %v505_v37 = vpop.f32.mrb[2].mxu0 }
 0x1ec   : > { %v506_v38 = vadd.f32 %v505_v37, %v401_v35  ;;  %v507_v39 = vpop.f32.mrb[3].mxu0  ;;  %770 = vmatmul.mubr.f32.vlgmr.msra.gmra.mrb[0].mxu1 %v524_v36 }
 0x1ed   : > { %772 = vmatprep.mubr.msk.f32.mxu1 %vm1022_vm1, %v1021_v18 }
 0x1ee   : > { %v525_v40 = vmul.f32 %v506_v38, %v506_v38 }
 0x1ef   : > { %v510_v42 = vpop.f32.mrb[4].mxu0 }
 0x1f0   : > { %v511_v43 = vadd.f32 %v510_v42, %v406_v41  ;;  %v512_v44 = vpop.f32.mrb[5].mxu0  ;;  %773 = vmatmul.mubr.f32.gmra.mrb[2].mxu1 %v525_v40 }
 0x1f1   : > { %775 = vmatprep.mubr.msk.f32.mxu1 %vm1022_vm1, %v1021_v18 }
 0x1f2   : > { %v526_v45 = vmul.f32 %v511_v43, %v511_v43 }
 0x1f3   : > { %v515_v47 = vpop.f32.mrb[6].mxu0 }
 0x1f4   : > { %v516_v48 = vadd.f32 %v515_v47, %v411_v46  ;;  %v517_v49 = vpop.f32.mrb[7].mxu0  ;;  %776 = vmatmul.mubr.f32.gmra.mrb[4].mxu1 %v526_v45 }
 0x1f5   : > { %778 = vmatprep.mubr.msk.f32.mxu1 %vm1022_vm1, %v1021_v18 }
 0x1f6   : > { %v527_v50 = vmul.f32 %v516_v48, %v516_v48 }
 0x1f7   : > { %v520_v52 = vpop.f32.mrb[8].mxu0 }
 0x1f8   : > { %v521_v53 = vadd.f32 %v520_v52, %v416_v51  ;;  %v522_v54 = vpop.f32.mrb[9].mxu0  ;;  %779 = vmatmul.mubr.f32.gmra.mrb[6].mxu1 %v527_v50 }
 0x1f9   : > { %781 = vmatprep.mubr.msk.f32.mxu1 %vm1022_vm1, %v1021_v18 }
 0x1fa   : > { %v528_v55 = vmul.f32 %v521_v53, %v521_v53 }
 0x1fc   : > { %782 = vmatmul.mubr.f32.gmra.mrb[8].mxu1 %v528_v55 }
 0x2bf   : > { %v595_v56 = vpop.f32.mrb[0].mxu1 }
 0x2c0   : > { %985 = vlog2.f32 %v595_v56  ;;  %v771_v57 = vpop.f32.mrb[1].mxu1 }
 0x2c3   : > { %v600_v58 = vpop.f32.mrb[2].mxu1 }
 0x2c4   : > { %987 = vlog2.f32 %v600_v58  ;;  %v774_v59 = vpop.f32.mrb[3].mxu1 }
 0x2c7   : > { %v605_v60 = vpop.f32.mrb[4].mxu1 }
 0x2c8   : > { %989 = vlog2.f32 %v605_v60  ;;  %v777_v61 = vpop.f32.mrb[5].mxu1 }
 0x2ca   : > { %v986_v62 = vpop.eup %985 }
 0x2cb   : > { %v620_v63 = vmul.f32 0.6931472, %v986_v62  ;;  %v610_v1 = vpop.f32.mrb[6].mxu1 }
 0x2cc   : > { %991 = vlog2.f32 %v610_v1  ;;  %v780_v2 = vpop.f32.mrb[7].mxu1 }
 0x2cd   : > { %v629_v3 = vmax.f32 %v620_v63, 1e-07 }
 0x2ce   : > { %v988_v4 = vpop.eup %987 }
 0x2cf   : > { %v634_v5 = vmin.f32 %v629_v3, 10000000.0  ;;  %v622_v6 = vmul.f32 0.6931472, %v988_v4  ;;  %v615_v7 = vpop.f32.mrb[8].mxu1 }
 0x2d0   : > { %993 = vlog2.f32 %v615_v7  ;;  %v783_v8 = vpop.f32.mrb[9].mxu1 }
 0x2d1   : > { %640 = vst.msk [vmem:[%s197_s30] sm:$0xff] %vm639_vm2, %v634_v5  ;;  %v630_v9 = vmax.f32 %v622_v6, 1e-07 }
 0x2d2   : > { %v990_v10 = vpop.eup %989 }
 0x2d3   : > { %v635_v11 = vmin.f32 %v630_v9, 10000000.0  ;;  %v624_v12 = vmul.f32 0.6931472, %v990_v10 }
 0x2d5   : > { %641 = vst.msk [vmem:[%s197_s30 + $0x8] sm:$0xff] %vm639_vm2, %v635_v11  ;;  %v631_v13 = vmax.f32 %v624_v12, 1e-07 }
 0x2d6   : > { %v992_v14 = vpop.eup %991 }
 0x2d7   : > { %v636_v15 = vmin.f32 %v631_v13, 10000000.0  ;;  %v626_v16 = vmul.f32 0.6931472, %v992_v14 }
 0x2d9   : > { %642 = vst.msk [vmem:[%s197_s30 + $0x10] sm:$0xff] %vm639_vm2, %v636_v15  ;;  %v632_v17 = vmax.f32 %v626_v16, 1e-07 }
 0x2da   : > { %v994_v18 = vpop.eup %993 }
 0x2db   : > { %v637_v19 = vmin.f32 %v632_v17, 10000000.0  ;;  %v628_v20 = vmul.f32 0.6931472, %v994_v18 }
 0x2dd   : > { %643 = vst.msk [vmem:[%s197_s30 + $0x18] sm:$0xff] %vm639_vm2, %v637_v19  ;;  %v633_v0 = vmax.f32 %v628_v20, 1e-07 }
 0x2df   : > { %v638_v21 = vmin.f32 %v633_v0, 10000000.0 }
 0x2e1   : > { %644 = vst.msk [vmem:[%s197_s30 + $0x20] sm:$0xff] %vm639_vm2, %v638_v21 }
 0x2e2 PF: > { %s14_s15 = sadd.s32 1, %s1001_s15  }
 0x2e3   : > { %p11_p4 = scmp.ge.s32.totalorder %s14_s15, 4  }
 0x2e5   :  { %13 = sbr.rel (!%p11_p4) target bundleno = 1 (0x1), region = 66 }

</bundles_post_ra>
